<compile_context>
chip_gen: v7x
topology: tpu7x:2x2x1
jax: 0.10.0
libtpu: 0.0.40
codegen_flags: <defaults>
</compile_context>

<pallas_src>
import jax
import jax.numpy as jnp
from jax.experimental import pallas as pl
from jax.experimental.pallas import tpu as pltpu

_LANE = 128
_SUBLANE = 8


def _round_up(a, m):
    return ((a + m - 1) // m) * m


def _sgnn_kernel(x_ref, wt_ref, b_ref, out_ref):
    """One node tile of the transposed product.

    x_ref   : (tile_n, F)    input dtype (cast to bf16 on the VPU here)
    wt_ref  : (C_pad, F)     fused weight (Wq@W)^T, bf16, resident
    b_ref   : (C_pad, 1)     bias, f32, resident
    out_ref : (C_pad, tile_n) f32 -- node dim on the 128-lane axis
    """
    x_bf = x_ref[...].astype(jnp.bfloat16)
    acc = jax.lax.dot_general(
        wt_ref[...], x_bf,
        dimension_numbers=(((1,), (1,)), ((), ())),   # contract over F: W^T @ x^T
        preferred_element_type=jnp.float32)           # (C_pad, tile_n), f32 acc
    out_ref[...] = acc + b_ref[...]


def sgnn_source_forward(x, edge_index, params, *, tile_n=2048):
    """SGNN_source forward (eval mode).

    `edge_index` is accepted for signature parity with the PyTorch module but
    unused: the LACombined* layer loop is not implementable from the provided
    source (see TODO above).  `params["wp"]` and `params["beta"]` only feed
    that omitted loop, so they are intentionally not passed to the kernel.
    """
    del edge_index
    wq = params["wq"].astype(jnp.float32)      # (F, H)
    w = params["w"].astype(jnp.float32)        # (H, C)
    b = params["b"].astype(jnp.float32)        # (C,)

    n, f = x.shape
    c = w.shape[1]
    c_pad = _round_up(c, _SUBLANE)             # 8-sublane pad only (not 128 lanes)

    # Fold the two projections once (f32), transpose, pad classes to 8 sublanes.
    wqw = jnp.dot(wq, w, preferred_element_type=jnp.float32)               # (F, C)
    wt = (jnp.zeros((c_pad, f), jnp.float32).at[:c, :].set(wqw.T)
          .astype(jnp.bfloat16))                                           # (C_pad, F)
    b_col = jnp.zeros((c_pad, 1), jnp.float32).at[:c, 0].set(b)            # (C_pad, 1)

    # ---- node-tile selection -------------------------------------------------
    x_bytes = x.dtype.itemsize
    row_bytes = 2 * f * x_bytes + 2 * c_pad * 4      # dbl-buffered x tile + out^T tile
    vmem_budget = 48 * 1024 * 1024                   # headroom under v7x's 64 MiB VMEM
    cap = max(_LANE, (vmem_budget // row_bytes) // _LANE * _LANE)
    tile_n = min(tile_n, cap)
    if n <= tile_n:
        tile_n = n                 # single full-extent block (any n is legal)
    else:
        tile_n = max(_LANE, (tile_n // _LANE) * _LANE)
        # Keep >= ~4 grid steps so both v7x TensorCores get work and the DMA
        # pipeline has something to overlap, but never drop below 512 rows
        # (per-step fixed overhead amortization).
        balanced = _round_up(pl.cdiv(n, 4), _LANE)
        tile_n = min(tile_n, max(512, balanced))
    grid = (pl.cdiv(n, tile_n),)

    vmem_bytes = (2 * tile_n * f * x_bytes       # x tiles (double buffered)
                  + 2 * c_pad * tile_n * 4       # out^T tiles (f32, double buffered)
                  + 2 * c_pad * f * 2            # fused weight (bf16)
                  + 2 * c_pad * 4)               # bias
    vmem_limit = int(min(max(vmem_bytes + (4 << 20), 32 << 20), 56 << 20))

    out_t = pl.pallas_call(
        _sgnn_kernel,
        out_shape=jax.ShapeDtypeStruct((c_pad, n), jnp.float32),
        grid_spec=pltpu.PrefetchScalarGridSpec(
            num_scalar_prefetch=0,
            grid=grid,
            in_specs=[
                pl.BlockSpec((tile_n, f), lambda i: (i, 0)),    # x node tile
                pl.BlockSpec((c_pad, f), lambda i: (0, 0)),     # fused weight^T (resident)
                pl.BlockSpec((c_pad, 1), lambda i: (0, 0)),     # bias (resident)
            ],
            out_specs=pl.BlockSpec((c_pad, tile_n), lambda i: (0, i)),
        ),
        compiler_params=pltpu.CompilerParams(
            dimension_semantics=("parallel",),   # node tiles are independent
            vmem_limit_bytes=vmem_limit,
        ),
    )(x, wt, b_col)

    # (C_pad, N) -> (N, C): tiny slab (32 B/node), ~16x smaller than the old
    # 128-lane-padded f32 output, so this slice+transpose is negligible.
    return out_t[:c, :].T


def init_params(key, num_features, hidden, num_classes):
    """PyTorch nn.Linear-style init (U(-1/sqrt(fan_in), 1/sqrt(fan_in)));
    beta initialized to 0.0 as in the module's __init__.  wp/beta are kept for
    module parity but unused (they only feed the omitted layer loop)."""
    k1, k2, k3, k4 = jax.random.split(key, 4)
    bound_f = 1.0 / jnp.sqrt(num_features)
    bound_h = 1.0 / jnp.sqrt(hidden)
    return {
        "wp": jax.random.uniform(k1, (num_features, hidden), jnp.float32,
                                 -bound_f, bound_f),
        "wq": jax.random.uniform(k2, (num_features, hidden), jnp.float32,
                                 -bound_f, bound_f),
        "w": jax.random.uniform(k3, (hidden, num_classes), jnp.float32,
                                -bound_h, bound_h),
        "b": jax.random.uniform(k4, (num_classes,), jnp.float32,
                                -bound_h, bound_h),
        "beta": jnp.float32(0.0),
    }


if __name__ == "__main__":
    # Small synthetic graph: 300 nodes (not a multiple of the tile, to exercise
    # the ragged last block), 128 input features (lane-aligned), hidden 32,
    # 4 classes.
    N, F, H, C = 300, 128, 32, 4
    key = jax.random.PRNGKey(0)
    kx, ke, kp = jax.random.split(key, 3)

    x = jax.random.normal(kx, (N, F), jnp.float32)
    # edge_index (2, E) like PyG; unused by the kernel (layer loop omitted).
    edge_index = jax.random.randint(ke, (2, 600), 0, N, jnp.int32)

    params = init_params(kp, F, H, C)

    # tile_n=128 here only to exercise a multi-step grid (including a partial
    # last block) at toy sizes; the production default is tile_n=2048.
    out = sgnn_source_forward(x, edge_index, params, tile_n=128)
    out = jax.block_until_ready(out)

    # Reference of the same (eval-mode, layer-loop-free) math in f32.
    q_ref = x @ params["wq"]
    ref = q_ref @ params["w"] + params["b"][None, :]
    assert out.shape == (N, C)
    assert jnp.allclose(out, ref, atol=2e-2, rtol=2e-2), (
        float(jnp.max(jnp.abs(out - ref))))

    print("KERNEL_OK")
</pallas_src>

<mosaic_0001>
module attributes {stable_mosaic.version = 11 : i64} {
  func.func @_sgnn_kernel(%arg0: i32, %arg1: memref<128x128xf32, #tpu.memory_space<vmem>>, %arg2: memref<8x128xbf16, #tpu.memory_space<vmem>>, %arg3: memref<8x1xf32, #tpu.memory_space<vmem>>, %arg4: memref<8x128xf32, #tpu.memory_space<vmem>>) attributes {dimension_semantics = [#tpu.dimension_semantics<parallel>], iteration_bounds = array<i64: 3>, scalar_prefetch = 0 : i64, scratch_operands = 0 : i64, tpu.core_type = #tpu.core_type<tc>, window_params = [{transform_indices = @transform_0, window_bounds = array<i64: 128, 128>}, {pipeline_mode = #tpu.pipeline_mode<synchronous>, transform_indices = @transform_1, window_bounds = array<i64: 8, 128>}, {pipeline_mode = #tpu.pipeline_mode<synchronous>, transform_indices = @transform_2, window_bounds = array<i64: 8, 1>}, {transform_indices = @transform_3, window_bounds = array<i64: 8, 128>}]} {
    %c0 = arith.constant 0 : index
    %c0_0 = arith.constant 0 : index
    %0 = vector.load %arg1[%c0, %c0_0] : memref<128x128xf32, #tpu.memory_space<vmem>>, vector<128x128xf32>
    %1 = arith.truncf %0 : vector<128x128xf32> to vector<128x128xbf16>
    %c0_1 = arith.constant 0 : index
    %c0_2 = arith.constant 0 : index
    %2 = vector.load %arg2[%c0_1, %c0_2] : memref<8x128xbf16, #tpu.memory_space<vmem>>, vector<8x128xbf16>
    %cst = arith.constant dense<0.000000e+00> : vector<8x128xf32>
    %3 = tpu.matmul %2, %1, %cst {dimension_numbers = #tpu.dot_dimension_numbers<[1], [1], [0], [0], [0, 0, 1, 0], [], []>} : vector<8x128xbf16>, vector<128x128xbf16>, vector<8x128xf32> -> vector<8x128xf32>
    %c0_3 = arith.constant 0 : index
    %c0_4 = arith.constant 0 : index
    %4 = vector.load %arg3[%c0_3, %c0_4] : memref<8x1xf32, #tpu.memory_space<vmem>>, vector<8x1xf32>
    %5 = vector.broadcast %4 : vector<8x1xf32> to vector<8x128xf32>
    %6 = arith.addf %3, %5 : vector<8x128xf32>
    %c0_5 = arith.constant 0 : index
    %c0_6 = arith.constant 0 : index
    %7 = vector.load %arg4[%c0_5, %c0_6] : memref<8x128xf32, #tpu.memory_space<vmem>>, vector<8x128xf32>
    tpu.vector_store %arg4[%c0_5, %c0_6], %6 {strides = array<i32>} : memref<8x128xf32, #tpu.memory_space<vmem>>, vector<8x128xf32>,
    return
  }
  func.func @transform_0(%arg0: i32) -> (i32, i32) {
    %c0_i32 = arith.constant 0 : i32
    %c0_i32_0 = arith.constant 0 : i32
    return %arg0, %c0_i32 : i32, i32
  }
  func.func @transform_1(%arg0: i32) -> (i32, i32) {
    %c0_i32 = arith.constant 0 : i32
    %c0_i32_0 = arith.constant 0 : i32
    %c0_i32_1 = arith.constant 0 : i32
    return %c0_i32, %c0_i32_0 : i32, i32
  }
  func.func @transform_2(%arg0: i32) -> (i32, i32) {
    %c0_i32 = arith.constant 0 : i32
    %c0_i32_0 = arith.constant 0 : i32
    %c0_i32_1 = arith.constant 0 : i32
    return %c0_i32, %c0_i32_0 : i32, i32
  }
  func.func @transform_3(%arg0: i32) -> (i32, i32) {
    %c0_i32 = arith.constant 0 : i32
    %c0_i32_0 = arith.constant 0 : i32
    return %c0_i32, %arg0 : i32, i32
  }
}

</mosaic_0001>

<bundles_post_ra>
// kernel: tpu_custom_call.1
= control target key start
LH: loop header
LB: loop body
LE: loop exit
PB: predicated region body
PF: predicated region fallthrough
CT: control target
= control target key end

     0   :  { %8 = vsyncpa [#allocation3], 0  ;;  %s751_s0 = inlined_call_operand.hbm [shape: f32[300,128], index: 0, kind: input, shape index: {}]   ;;  %s752_s1 = inlined_call_operand.vmem [shape: bf16[8,128], index: 1, kind: input, shape index: {}]   ;;  %s753_s2 = inlined_call_operand.vmem [shape: f32[8,1], index: 2, kind: input, shape index: {}]   ;;  %s754_s3 = inlined_call_operand.hbm [shape: f32[8,300], index: 3, kind: output, shape index: {}]  }
   0x1   :  { %10 = vsyncpa [#allocation3 + $0x1], 0 }
   0x2   :  { %11 = vsyncpa [#allocation4], 0 }
   0x3   :  { %13 = vsyncpa [#allocation4 + $0x1], 0  ;;  %s573_s12 = smov 0   ;;  %s575_s13 = smov 0  }
   0x4   :  { %s577_s14 = smov 0   ;;  %s579_s15 = smov 0  }
   0x5 LB: > { %s594_s16 = sadd.s32 4294967295, %s544_s15   ;;  %s357_s17 = sadd.s32 4294967294, %s544_s15   ;;  %s544_s15 = sphi %s579_s15, %s762_s15   ;;  %s540_s14 = sphi %s577_s14, %s761_s14   ;;  %s536_s13 = sphi %s575_s13, %s760_s13   ;;  %s532_s12 = sphi %s573_s12, %s759_s12  }
   0x6   : > { %s598_s18 = sadd.s32 1, %s544_s15   ;;  %s26_s19 = sadd.s32 1, %s540_s14 }
   0x7   : > { %s23_s20 = ssub.s32 %s544_s15, %s598_s18  ;;  %p33_p0 = scmp.ne.s32.totalorder %s540_s14, %s536_s13 }
   0x8   : > { %p24_p1 = scmp.eq.s32.totalorder %s23_s20, 0  ;;  %p34_p2 = scmp.eq.s32.totalorder %s544_s15, 0 }
   0x9   : > { %p39_p3 = scmp.ne.s32.totalorder %s536_s13, %s532_s12  ;;  %p40_p4 = scmp.eq.s32.totalorder %s594_s16, 0 }
   0xa   : > { %s610_s21 = scalar_select %p24_p1, %s540_s14, %s26_s19  }
   0xb   : > { %p35_p5 = por %p34_p2, %p33_p0  ;;  %p612_p6 = por %p40_p4, %p39_p3 }
   0xc   : > { %p105_p7 = scmp.eq.s32.totalorder %s594_s16, 2  ;;  %p111_p8 = scmp.eq.s32.totalorder %s357_s17, 2 }
   0xd   : > { %p359_p11 = scmp.ge.s32.totalorder %s544_s15, 3 }
   0xe   : > { %p617_p9 = por %p105_p7, %p33_p0  ;;  %p621_p10 = por %p111_p8, %p39_p3 }
   0xf   : > { %133 = sbr.rel (%p359_p11) target bundleno = 57 (0x39), region = 24 }
  0x10   : > { %s757_s24 = scalar_select %p621_p10, 1, 0 }
  0x16   : > { %136 = sbr.rel (!%p35_p5) target bundleno = 57 (0x39), region = 28  ;;  %s137_s25 = sand.u32 (%p35_p5), 1, %s540_s14  }
  0x17   : > { %s361_s26 = sshll.u32 (%p35_p5), %s544_s15, 4  ;;  %s360_s27 = sshll.u32 (%p35_p5), %s137_s25, 7 }
  0x18   : > { %s143_s28 = ssub.s32 (%p35_p5), 38, %s361_s26  ;;  %s631_s4 = scalar_lea.sflag (%p35_p5), [#allocation3], %s137_s25 }
  0x19   : > { %p144_p12 = scmp.lt.s32.totalorder (%p35_p5), %s143_s28, 16  ;;  %s141_s5 = scalar_lea.vmem (%p35_p5), [#allocation2], %s360_s27 }
  0x1d   : > { %s764_s28 = smov (!%p144_p12, %s143_s28), 16 }
  0x1e   : > { %s628_s29 = sshll.u32 %s764_s28, 7 }
  0x1f   : > { %s148_s30 = ssub.s32 2048, %s628_s29 }
  0x20   : > { %149 = vsyncadd %s631_s4, %s148_s30  ;;  %p363_p13 = scmp.ne.s32.totalorder %s628_s29, 0  ;;  %s374_s6 = sshll.u32 %s544_s15, 11 }
  0x21   : > { %s639_s9 = scalar_lea.hbm %s751_s0, %s374_s6  ;;  %s154_s10 = sshll.u32 %s141_s5, 4  ;;  %s641_s10 = int_to_ptr.vmem [resolvable:$true] %s154_s10 }
  0x22   : > { %s450_s11 = scalar_lea.hbm %s639_s9, %s628_s29  ;;  %s454_s20 = scalar_lea.hbm %s751_s0, 4864 }
  0x23   : > { %p451_p0 = scmp.ne.s32.totalorder %s639_s9, %s450_s11  ;;  %p455_p3 = scmp.lt.u32.totalorder %s639_s9, %s751_s0 }
  0x24   : > { %p456_p4 = scmp.lt.u32.totalorder %s454_s20, %s450_s11  ;;  %p458_p7 = scmp.lt.u32.totalorder %s450_s11, %s639_s9 }
  0x25   : > { %p452_p1 = pnand %p451_p0, %p363_p13 }
  0x26   : > { %p457_p5 = por %p456_p4, %p455_p3 }
  0x27   : > { %p453_p2 = pneg %p452_p1 }
  0x28   : > { %p459_p8 = por %p458_p7, %p457_p5 }
  0x2a   : > { %p460_p11 = pnand %p459_p8, %p453_p2 }
  0x2c   : > { %463 = shalt.err (!%p460_p11)
}
  0x2d   : > { %s464_s27 = scalar_lea.vmem %s641_s10, %s628_s29  ;;  %s546_s28 = smov [#allocation2]  }
  0x2e   : > { %p465_p12 = scmp.ne.s32.totalorder %s641_s10, %s464_s27  ;;  %s468_s30 = sshll.u32 %s546_s28, 4  ;;  %s469_s30 = int_to_ptr.vmem [resolvable:$false] %s468_s30 }
  0x2f   : > { %s470_s5 = scalar_lea.vmem %s469_s30, 4096  ;;  %p471_p10 = scmp.lt.s32.totalorder %s641_s10, %s469_s30 }
  0x30   : > { %p466_p0 = pnand %p465_p12, %p363_p13  ;;  %p472_p3 = scmp.lt.s32.totalorder %s470_s5, %s464_s27 }
  0x32   : > { %p467_p1 = pneg %p466_p0  ;;  %p473_p4 = por %p472_p3, %p471_p10 }
  0x34   : > { %p474_p5 = pnand %p473_p4, %p467_p1 }
  0x36   : > { %477 = shalt.err (!%p474_p5)
}
  0x37   : > { %s547_s6 = smov 128   ;;  %s548_s7 = smov 8  }
  0x38   : > { %160 = dma.hbm_to_vmem [thread:$0]  (%p363_p13), %s639_s9, %s628_s29, %s641_s10, %s631_s4, %s547_s6, %s547_s6, %s548_s7  }
  0x39 PF: > { %p367_p2 = scmp.ge.s32.totalorder %s544_s15, 1  ;;  %p162_p7 = scmp.lt.s32.totalorder %s544_s15, 4 }
  0x3b   : > { %p163_p8 = pnand %p367_p2, %p162_p7 }
  0x3c   : > { %s671_s8 = sand.u32 (!%p163_p8), 1, %s536_s13  }
  0x3d   : > { %166 = sbr.rel (%p163_p8) target bundleno = 363 (0x16b), region = 32  ;;  %s368_s11 = sshll.u32 (!%p163_p8), %s671_s8, 7 }
  0x3e   : > { %s169_s17 = scalar_lea.sflag (!%p163_p8), [#allocation3], %s671_s8  ;;  %s675_s19 = scalar_lea.vmem (!%p163_p8), [#allocation2], %s368_s11 }
  0x44   : > { %523 = dma.done.wait (%p612_p6), %s169_s17, 2048  }
  0x45   : > { %525 = vsyncadd (%p612_p6), %s169_s17, 4294965248  ;;  %v549_v0 = vmov 0.0   ;;  %vm550_vm0 = vmmov 0   ;;  %v551_v1 = vmov 0   ;;  %v201_v2 = vld [vmem:[%s675_s19] sm:$0xff]  ;;  %v202_v3 = vld [vmem:[%s675_s19 + $0x8] sm:$0xff] }
  0x46   : > { %384 = vmatprep.subr.bf16.mxu0 %v549_v0  ;;  %400 = vmatprep.mubr.msk.bf16.mxu0 %vm550_vm0, %v549_v0  ;;  %v217_v4 = vpack.c.bf16 %v202_v3, %v201_v2  ;;  %v203_v5 = vld [vmem:[%s675_s19 + $0x10] sm:$0xff]  ;;  %v204_v6 = vld [vmem:[%s675_s19 + $0x18] sm:$0xff]  ;;  %v226_v7 = vld [vmem:[%s753_s2] sm:$0xff]  ;;  %s369_s10 = sshll.u32 %s671_s8, 3  ;;  %s371_s20 = sshll.u32 %s594_s16, 7 }
  0x47   : > { %449 = vset.pattern.permute.xlu0 %v551_v1  ;;  %v218_v8 = vpack.c.bf16 %v204_v6, %v203_v5  ;;  %v205_v9 = vld [vmem:[%s675_s19 + $0x20] sm:$0xff]  ;;  %v206_v10 = vld [vmem:[%s675_s19 + $0x28] sm:$0xff]  ;;  %v207_v12 = vld [vmem:[%s675_s19 + $0x30] sm:$0xff]  ;;  %s194_s25 = scalar_lea.vmem [#allocation5], %s369_s10  ;;  %s708_s30 = scalar_lea.hbm %s754_s3, %s371_s20 }
  0x48   : > { %385 = vmatpush3.bf16.xpose.msra.mxu0 %v217_v4  ;;  %229 = vperm.xlu0 %449, %v226_v7   ;;  %v219_v11 = vpack.c.bf16 %v206_v10, %v205_v9  ;;  %v208_v13 = vld [vmem:[%s675_s19 + $0x38] sm:$0xff]  ;;  %v209_v15 = vld [vmem:[%s675_s19 + $0x40] sm:$0xff]  ;;  %v210_v16 = vld [vmem:[%s675_s19 + $0x48] sm:$0xff]  ;;  %s287_s26 = sshll.u32 %s194_s25, 4  ;;  %s274_s5 = scalar_lea.sflag [#allocation4], %s671_s8  ;;  %s710_s26 = int_to_ptr.vmem [resolvable:$true] %s287_s26 }
  0x49   : > { %386 = vmatprep.subr.bf16.mxu0 %v549_v0  ;;  %v220_v14 = vpack.c.bf16 %v208_v13, %v207_v12  ;;  %v221_v17 = vpack.c.bf16 %v210_v16, %v209_v15  ;;  %v211_v18 = vld [vmem:[%s675_s19 + $0x50] sm:$0xff]  ;;  %v212_v19 = vld [vmem:[%s675_s19 + $0x58] sm:$0xff]  ;;  %v213_v21 = vld [vmem:[%s675_s19 + $0x60] sm:$0xff]  ;;  %s478_s16 = scalar_lea.vmem %s710_s26, 128  ;;  %s552_s6 = smov [#allocation5]  }
  0x4a   : > { %v222_v20 = vpack.c.bf16 %v212_v19, %v211_v18  ;;  %v214_v22 = vld [vmem:[%s675_s19 + $0x68] sm:$0xff]  ;;  %v215_v24 = vld [vmem:[%s675_s19 + $0x70] sm:$0xff]  ;;  %v216_v25 = vld [vmem:[%s675_s19 + $0x78] sm:$0xff]  ;;  %p479_p6 = scmp.ne.s32.totalorder %s710_s26, %s478_s16  ;;  %s482_s7 = sshll.u32 %s552_s6, 4  ;;  %s483_s7 = int_to_ptr.vmem [resolvable:$false] %s482_s7 }
  0x4b   : > { %v223_v23 = vpack.c.bf16 %v214_v22, %v213_v21  ;;  %v224_v26 = vpack.c.bf16 %v216_v25, %v215_v24  ;;  %v225_v27 = vld [vmem:[%s752_s1] sm:$0xf]  ;;  %s484_s11 = scalar_lea.vmem %s483_s7, 256  ;;  %p485_p11 = scmp.lt.s32.totalorder %s710_s26, %s483_s7 }
  0x4c   : > { %p480_p10 = pnand %p479_p6, %p617_p9  ;;  %p486_p12 = scmp.lt.s32.totalorder %s484_s11, %s478_s16 }
  0x4e   : > { %p481_p13 = pneg %p480_p10  ;;  %p487_p0 = por %p486_p12, %p485_p11 }
  0x50   : > { %387 = vmatpush3.bf16.xpose.msra.mxu0 %v218_v8  ;;  %p488_p1 = pnand %p487_p0, %p481_p13 }
  0x51   : > { %388 = vmatprep.subr.bf16.mxu0 %v549_v0 }
  0x58   : > { %389 = vmatpush3.bf16.xpose.msra.mxu0 %v219_v11 }
  0x59   : > { %390 = vmatprep.subr.bf16.mxu0 %v549_v0 }
  0x60   : > { %391 = vmatpush3.bf16.xpose.msra.mxu0 %v220_v14 }
  0x61   : > { %392 = vmatprep.subr.bf16.mxu0 %v549_v0 }
  0x68   : > { %393 = vmatpush3.bf16.xpose.msra.mxu0 %v221_v17 }
  0x69   : > { %394 = vmatprep.subr.bf16.mxu0 %v549_v0 }
  0x70   : > { %395 = vmatpush3.bf16.xpose.msra.mxu0 %v222_v20 }
  0x71   : > { %396 = vmatprep.subr.bf16.mxu0 %v549_v0 }
  0x78   : > { %397 = vmatpush3.bf16.xpose.msra.mxu0 %v223_v23 }
  0x79   : > { %398 = vmatprep.subr.bf16.mxu0 %v549_v0 }
  0x80   : > { %399 = vmatpush3.bf16.xpose.msra.mxu0 %v224_v26 }
  0x87   : > { %401 = vmatmul.mubr.bf16.vlgmr.msra.gmra.mrb[0].mxu0 %v225_v27 }
  0xc7   : > { %v230_v28 = vpop.permute.xlu0 %229 }
 0x15a   : > { %v266_v29 = vpop.f32.mrb[0].mxu0 }
 0x15b   : > { %v267_v30 = vadd.f32 %v266_v29, %v230_v28  ;;  %v402_v31 = vpop.f32.mrb[1].mxu0 }
 0x15c   : > { %v269_v32 = vpop.f32.mrb[2].mxu0 }
 0x15d   : > { %272 = vst [vmem:[%s194_s25] sm:$0xff] %v267_v30  ;;  %v403_v33 = vpop.f32.mrb[3].mxu0 }
 0x15e   : > { %491 = shalt.err (!%p488_p1)
}
 0x15f   : > { %s492_s8 = scalar_lea.hbm %s708_s30, 128  ;;  %s496_s22 = scalar_lea.hbm %s754_s3, 384 }
 0x160   : > { %p493_p3 = scmp.ne.s32.totalorder %s708_s30, %s492_s8  ;;  %p497_p2 = scmp.lt.u32.totalorder %s708_s30, %s754_s3 }
 0x161   : > { %p498_p7 = scmp.lt.u32.totalorder %s496_s22, %s492_s8  ;;  %p500_p6 = scmp.lt.u32.totalorder %s492_s8, %s708_s30 }
 0x162   : > { %p494_p4 = pnand %p493_p3, %p617_p9 }
 0x163   : > { %p499_p8 = por %p498_p7, %p497_p2 }
 0x164   : > { %p495_p5 = pneg %p494_p4 }
 0x165   : > { %p501_p10 = por %p500_p6, %p499_p8 }
 0x167   : > { %p502_p13 = pnand %p501_p10, %p495_p5 }
 0x169   : > { %505 = shalt.err (!%p502_p13)
}
 0x16a   : > { %405 = dma.vmem_to_hbm [thread:$0]  (%p617_p9), %s710_s26, 128, %s708_s30, %s274_s5  }
 0x16b PF: > { %p411_p11 = scmp.ge.s32.totalorder %s544_s15, 2  ;;  %s299_s9 = sand.u32 1, %s532_s12  }
 0x16c   : > { %p758_p12 = scmp.ne.s32.totalorder %s757_s24, 0  ;;  %s300_s10 = scalar_lea.sflag [#allocation4], %s299_s9 }
 0x16e   : > { %p408_p0 = pnand %p411_p11, %p758_p12 }
 0x170   : > { %527 = dma.done.wait (!%p408_p0), %s300_s10, 128  }
 0x171   : > { %529 = vsyncadd (!%p408_p0), %s300_s10, 4294967168  ;;  %p16_p1 = scmp.ge.s32.totalorder %s598_s18, 5   ;;  %s759_s12 = smov %s536_s13 }
 0x172   : > { %s760_s13 = smov %s540_s14  ;;  %s761_s14 = smov %s610_s21 }
 0x173   : > { %s762_s15 = smov %s598_s18  ;;  %18 = sbr.rel (!%p16_p1) target bundleno = 5 (0x5), region = 77 }
 0x17a   :  { %305 = vsyncpa [#allocation3], 1 }
 0x17b   :  { %307 = vsyncpa [#allocation3 + $0x1], 1 }
 0x17c   :  { %308 = vsyncpa [#allocation4], 1 }
 0x17d   :  { %310 = vsyncpa [#allocation4 + $0x1], 1 }

</bundles_post_ra>
